<compile_context>
chip_gen: v7x
topology: tpu7x:2x2x1
jax: 0.10.0
libtpu: 0.0.40
codegen_flags: <defaults>
</compile_context>

<pallas_src>
import functools
import math
from typing import NamedTuple

import jax
import jax.numpy as jnp
from jax.experimental import pallas as pl
from jax.experimental.pallas import tpu as pltpu

_NEG_INF = -1e30  # large-negative mask value (avoids -inf arithmetic edge cases)


def _round_up(x: int, m: int) -> int:
    return ((x + m - 1) // m) * m


def _categorical_kernel(x_ref, w_ref, b_ref, logits_ref, probs_ref, *, valid_n):
    # Linear: raw = x @ W^T + b  (W already transposed & padded host-side)
    raw = jnp.dot(x_ref[...], w_ref[...],
                  preferred_element_type=jnp.float32) + b_ref[...]

    n_pad = raw.shape[-1]
    if valid_n != n_pad:
        # Padded output columns (zero weight/bias -> raw==0) must not take part
        # in the softmax: push them to ~-inf before the max / sum.
        col = jax.lax.broadcasted_iota(jnp.int32, raw.shape, 1)
        raw = jnp.where(col < valid_n, raw, _NEG_INF)

    # Numerically-stable log-softmax; exp(shifted) is computed ONCE and reused
    # for both the normalizer and the probabilities (halves EUP work).
    m = jnp.max(raw, axis=-1, keepdims=True)
    shifted = raw - m
    e = jnp.exp(shifted)
    s = jnp.sum(e, axis=-1, keepdims=True)
    lse = jnp.log(s)

    norm_logits = shifted - lse
    logits_ref[...] = norm_logits.astype(logits_ref.dtype)
    probs_ref[...] = (e / s).astype(probs_ref.dtype)  # exact divide for 1e-5 tol


class FixedCategorical(NamedTuple):
    """Minimal stand-in for torch.distributions.Categorical outputs."""
    logits: jax.Array   # normalized: logits - logsumexp(logits, -1)
    probs: jax.Array    # softmax(raw_logits)


def categorical_forward(x, weight, bias, *, tb_target=512):
    """x: [B, num_inputs], weight: [num_outputs, num_inputs], bias: [num_outputs]."""
    B, num_inputs = x.shape
    num_outputs = weight.shape[0]

    # ---- host-side padding to TPU-friendly shapes -------------------------
    K_pad = _round_up(num_inputs, 128)   # lane-aligned contraction dim
    N_pad = _round_up(num_outputs, 128)  # lane-dense outputs -> unmasked vst

    # Batch tile: sweepable target (512 amortizes per-step overhead and keeps
    # 2 inputs x 2 buffers + 2 outputs x 2 buffers well under v7x's 64 MiB VMEM).
    TB = tb_target if B >= tb_target else _round_up(B, 8)
    B_pad = _round_up(B, TB)

    x_p = jnp.zeros((B_pad, K_pad), jnp.float32).at[:B, :num_inputs].set(x)
    w_t = jnp.zeros((K_pad, N_pad), jnp.float32).at[:num_inputs, :num_outputs].set(weight.T)
    b2 = jnp.zeros((1, N_pad), jnp.float32).at[0, :num_outputs].set(bias)

    kernel = functools.partial(_categorical_kernel, valid_n=num_outputs)

    cost = pl.CostEstimate(
        flops=2 * B * num_inputs * num_outputs,
        transcendentals=B * num_outputs,
        bytes_accessed=(x_p.size + w_t.size + b2.size + 2 * B_pad * N_pad) * 4,
    )

    logits_p, probs_p = pl.pallas_call(
        kernel,
        out_shape=(
            jax.ShapeDtypeStruct((B_pad, N_pad), jnp.float32),
            jax.ShapeDtypeStruct((B_pad, N_pad), jnp.float32),
        ),
        grid=(B_pad // TB,),
        in_specs=[
            pl.BlockSpec((TB, K_pad), lambda i: (i, 0)),     # batch-tiled x
            pl.BlockSpec((K_pad, N_pad), lambda i: (0, 0)),  # W stays resident
            pl.BlockSpec((1, N_pad), lambda i: (0, 0)),      # bias stays resident
        ],
        out_specs=(
            pl.BlockSpec((TB, N_pad), lambda i: (i, 0)),
            pl.BlockSpec((TB, N_pad), lambda i: (i, 0)),
        ),
        compiler_params=pltpu.CompilerParams(
            dimension_semantics=("parallel",)),   # megacore sharding on v7x
        cost_estimate=cost,
    )(x_p, w_t, b2)

    # Strip batch / lane padding.
    logits = logits_p[:B, :num_outputs]
    probs = probs_p[:B, :num_outputs]
    return FixedCategorical(logits=logits, probs=probs)

# TODO(synk): torch.distributions.Categorical.sample()/log_prob()/entropy() are
# not part of this forward pass; only the distribution parameters are computed.


def init_linear_params(key, num_inputs, num_outputs):
    # Deterministic init mirroring nn.Linear defaults: U(-1/sqrt(fan_in), +)
    kw, kb = jax.random.split(key)
    bound = 1.0 / math.sqrt(num_inputs)
    weight = jax.random.uniform(kw, (num_outputs, num_inputs),
                                jnp.float32, -bound, bound)
    bias = jax.random.uniform(kb, (num_outputs,), jnp.float32, -bound, bound)
    return weight, bias


if __name__ == "__main__":
    key = jax.random.PRNGKey(0)
    k_x, k_p = jax.random.split(key)

    batch, num_inputs, num_outputs = 8, 32, 16
    x = jax.random.normal(k_x, (batch, num_inputs), jnp.float32)
    weight, bias = init_linear_params(k_p, num_inputs, num_outputs)

    dist = categorical_forward(x, weight, bias)
    jax.block_until_ready(dist.logits)
    jax.block_until_ready(dist.probs)

    # Reference check in plain JAX
    raw_ref = x @ weight.T + bias
    logits_ref = raw_ref - jax.scipy.special.logsumexp(raw_ref, axis=-1,
                                                       keepdims=True)
    probs_ref = jax.nn.softmax(raw_ref, axis=-1)
    assert dist.logits.shape == (batch, num_outputs)
    assert dist.probs.shape == (batch, num_outputs)
    assert jnp.allclose(dist.logits, logits_ref, atol=1e-5)
    assert jnp.allclose(dist.probs, probs_ref, atol=1e-5)
    assert jnp.allclose(jnp.sum(dist.probs, axis=-1), 1.0, atol=1e-5)

    print("KERNEL_OK")
</pallas_src>

<mosaic_0001>
module attributes {stable_mosaic.version = 11 : i64} {
  func.func @_categorical_kernel(%arg0: i32, %arg1: memref<8x128xf32, #tpu.memory_space<vmem>>, %arg2: memref<128x128xf32, #tpu.memory_space<vmem>>, %arg3: memref<1x128xf32, #tpu.memory_space<vmem>>, %arg4: memref<8x128xf32, #tpu.memory_space<vmem>>, %arg5: memref<8x128xf32, #tpu.memory_space<vmem>>) attributes {dimension_semantics = [#tpu.dimension_semantics<parallel>], iteration_bounds = array<i64: 1>, scalar_prefetch = 0 : i64, scratch_operands = 0 : i64, tpu.core_type = #tpu.core_type<tc>, window_params = [{transform_indices = @transform_0, window_bounds = array<i64: 8, 128>}, {pipeline_mode = #tpu.pipeline_mode<synchronous>, transform_indices = @transform_1, window_bounds = array<i64: 128, 128>}, {pipeline_mode = #tpu.pipeline_mode<synchronous>, transform_indices = @transform_2, window_bounds = array<i64: 1, 128>}, {transform_indices = @transform_3, window_bounds = array<i64: 8, 128>}, {transform_indices = @transform_4, window_bounds = array<i64: 8, 128>}]} {
    %c0 = arith.constant 0 : index
    %c0_0 = arith.constant 0 : index
    %0 = vector.load %arg1[%c0, %c0_0] : memref<8x128xf32, #tpu.memory_space<vmem>>, vector<8x128xf32>
    %c0_1 = arith.constant 0 : index
    %c0_2 = arith.constant 0 : index
    %1 = vector.load %arg2[%c0_1, %c0_2] : memref<128x128xf32, #tpu.memory_space<vmem>>, vector<128x128xf32>
    %cst = arith.constant dense<0.000000e+00> : vector<8x128xf32>
    %2 = tpu.matmul %0, %1, %cst {dimension_numbers = #tpu.dot_dimension_numbers<[1], [0], [0], [1], [0, 0, 1, 1], [], []>} : vector<8x128xf32>, vector<128x128xf32>, vector<8x128xf32> -> vector<8x128xf32>
    %c0_3 = arith.constant 0 : index
    %c0_4 = arith.constant 0 : index
    %3 = vector.load %arg3[%c0_3, %c0_4] : memref<1x128xf32, #tpu.memory_space<vmem>>, vector<1x128xf32>
    %4 = vector.broadcast %3 : vector<1x128xf32> to vector<8x128xf32>
    %5 = arith.addf %2, %4 : vector<8x128xf32>
    %6 = tpu.iota {dimensions = array<i32: 1>} : vector<8x128xi32>
    %c16_i32 = arith.constant 16 : i32
    %7 = vector.broadcast %c16_i32 : i32 to vector<8x128xi32>
    %8 = arith.cmpi slt, %6, %7 : vector<8x128xi32>
    %cst_5 = arith.constant -1.000000e+30 : f32
    %9 = vector.broadcast %cst_5 : f32 to vector<8x128xf32>
    %10 = arith.select %8, %5, %9 : vector<8x128xi1>, vector<8x128xf32>
    %cst_6 = arith.constant dense<0xFF800000> : vector<8xf32>
    %11 = vector.multi_reduction <maximumf>, %10, %cst_6 [1] : vector<8x128xf32> to vector<8xf32>
    %12 = vector.shape_cast %11 : vector<8xf32> to vector<8x1xf32>
    %13 = vector.broadcast %12 : vector<8x1xf32> to vector<8x128xf32>
    %14 = arith.subf %10, %13 : vector<8x128xf32>
    %15 = math.exp %14 : vector<8x128xf32>
    %cst_7 = arith.constant dense<0.000000e+00> : vector<8xf32>
    %16 = vector.multi_reduction <add>, %15, %cst_7 [1] : vector<8x128xf32> to vector<8xf32>
    %17 = vector.shape_cast %16 : vector<8xf32> to vector<8x1xf32>
    %18 = math.log %17 : vector<8x1xf32>
    %19 = vector.broadcast %18 : vector<8x1xf32> to vector<8x128xf32>
    %20 = arith.subf %14, %19 : vector<8x128xf32>
    %c0_8 = arith.constant 0 : index
    %c0_9 = arith.constant 0 : index
    %21 = vector.load %arg4[%c0_8, %c0_9] : memref<8x128xf32, #tpu.memory_space<vmem>>, vector<8x128xf32>
    tpu.vector_store %arg4[%c0_8, %c0_9], %20 {strides = array<i32>} : memref<8x128xf32, #tpu.memory_space<vmem>>, vector<8x128xf32>,
    %22 = vector.broadcast %17 : vector<8x1xf32> to vector<8x128xf32>
    %23 = arith.divf %15, %22 : vector<8x128xf32>
    %c0_10 = arith.constant 0 : index
    %c0_11 = arith.constant 0 : index
    %24 = vector.load %arg5[%c0_10, %c0_11] : memref<8x128xf32, #tpu.memory_space<vmem>>, vector<8x128xf32>
    tpu.vector_store %arg5[%c0_10, %c0_11], %23 {strides = array<i32>} : memref<8x128xf32, #tpu.memory_space<vmem>>, vector<8x128xf32>,
    return
  }
  func.func @transform_0(%arg0: i32) -> (i32, i32) {
    %c0_i32 = arith.constant 0 : i32
    %c0_i32_0 = arith.constant 0 : i32
    return %arg0, %c0_i32 : i32, i32
  }
  func.func @transform_1(%arg0: i32) -> (i32, i32) {
    %c0_i32 = arith.constant 0 : i32
    %c0_i32_0 = arith.constant 0 : i32
    %c0_i32_1 = arith.constant 0 : i32
    return %c0_i32, %c0_i32_0 : i32, i32
  }
  func.func @transform_2(%arg0: i32) -> (i32, i32) {
    %c0_i32 = arith.constant 0 : i32
    %c0_i32_0 = arith.constant 0 : i32
    %c0_i32_1 = arith.constant 0 : i32
    return %c0_i32, %c0_i32_0 : i32, i32
  }
  func.func @transform_3(%arg0: i32) -> (i32, i32) {
    %c0_i32 = arith.constant 0 : i32
    %c0_i32_0 = arith.constant 0 : i32
    return %arg0, %c0_i32 : i32, i32
  }
  func.func @transform_4(%arg0: i32) -> (i32, i32) {
    %c0_i32 = arith.constant 0 : i32
    %c0_i32_0 = arith.constant 0 : i32
    return %arg0, %c0_i32 : i32, i32
  }
}

</mosaic_0001>

<bundles_post_ra>
// kernel: tpu_custom_call.1
= control target key start
LH: loop header
LB: loop body
LE: loop exit
PB: predicated region body
PF: predicated region fallthrough
CT: control target
= control target key end

     0   :  { %10 = vsyncpa [#allocation3], 0  ;;  %s466_s0 = inlined_call_operand.hbm [shape: f32[8,128], index: 0, kind: input, shape index: {}]   ;;  %s467_s1 = inlined_call_operand.hbm [shape: f32[128,128], index: 1, kind: input, shape index: {}]   ;;  %s468_s2 = inlined_call_operand.vmem [shape: f32[1,128], index: 2, kind: input, shape index: {}]   ;;  %s469_s3 = inlined_call_operand.hbm [shape: f32[8,128], index: 3, kind: output, shape index: {0}]   ;;  %s470_s4 = inlined_call_operand.hbm [shape: f32[8,128], index: 4, kind: output, shape index: {1}]  }
   0x1   :  { %11 = vsyncpa [#allocation6], 0 }
   0x2   :  { %12 = vsyncpa [#allocation4], 0 }
   0x3   :  { %13 = vsyncpa [#allocation9], 0  ;;  %s374_s15 = smov [#allocation2]   ;;  %s375_s17 = smov [#allocation5]  }
   0x4   :  { %s20_s16 = sshll.u32 %s374_s15, 4  ;;  %s29_s18 = sshll.u32 %s375_s17, 4  ;;  %s21_s16 = int_to_ptr.vmem [resolvable:$true] %s20_s16  ;;  %s408_s18 = int_to_ptr.vmem [resolvable:$true] %s29_s18 }
   0x5   :  { %s278_s21 = scalar_lea.hbm %s466_s0, 128 }
   0x6   :  { %p279_p0 = scmp.ne.s32.totalorder %s466_s0, %s278_s21  ;;  %p282_p1 = scmp.lt.u32.totalorder %s278_s21, %s466_s0 }
   0x8   :  { %p284_p2 = pnand %p282_p1, %p279_p0 }
   0xa   :  { %287 = shalt.err (!%p284_p2)
}
   0xb   :  { %s288_s26 = scalar_lea.vmem %s21_s16, 128  ;;  %p293_p4 = scmp.lt.s32.totalorder %s21_s16, %s21_s16 }
   0xc   :  { %p289_p3 = scmp.ne.s32.totalorder %s21_s16, %s288_s26  ;;  %p294_p5 = scmp.lt.s32.totalorder %s288_s26, %s288_s26 }
   0xe   :  { %p295_p6 = por %p294_p5, %p293_p4 }
  0x10   :  { %p296_p7 = pnand %p295_p6, %p289_p3 }
  0x12   :  { %299 = shalt.err (!%p296_p7)
}
  0x13   :  { %23 = dma.hbm_to_vmem [thread:$0]  %s466_s0, 128, %s21_s16, [#allocation3]  }
  0x14   :  { %s300_s5 = scalar_lea.hbm %s467_s1, 2048 }
  0x15   :  { %p301_p8 = scmp.ne.s32.totalorder %s467_s1, %s300_s5  ;;  %p304_p9 = scmp.lt.u32.totalorder %s300_s5, %s467_s1 }
  0x17   :  { %p306_p10 = pnand %p304_p9, %p301_p8 }
  0x19   :  { %309 = shalt.err (!%p306_p10)
}
  0x1a   :  { %s310_s10 = scalar_lea.vmem %s408_s18, 2048  ;;  %p315_p12 = scmp.lt.s32.totalorder %s408_s18, %s408_s18 }
  0x1b   :  { %p311_p11 = scmp.ne.s32.totalorder %s408_s18, %s310_s10  ;;  %p316_p13 = scmp.lt.s32.totalorder %s310_s10, %s310_s10 }
  0x1d   :  { %p317_p0 = por %p316_p13, %p315_p12 }
  0x1f   :  { %p318_p1 = pnand %p317_p0, %p311_p11 }
  0x21   :  { %321 = shalt.err (!%p318_p1)
}
  0x22   :  { %s376_s0 = smov 128   ;;  %s377_s11 = smov 8  }
  0x23   :  { %35 = dma.hbm_to_vmem [thread:$0]  %s467_s1, 2048, %s408_s18, [#allocation6], %s376_s0, %s376_s0, %s377_s11  }
  0x24   :  { %366 = dma.done.wait [#allocation3], 128  }
  0x25   :  { %367 = vsyncadd [#allocation3], 4294967168 }
  0x26   :  { %368 = dma.done.wait [#allocation6], 2048  }
  0x27   :  { %369 = vsyncadd [#allocation6], 4294965248  ;;  %v378_v0 = vmov 0.0|0.0   ;;  %vm379_vm0 = vmmov 0   ;;  %v380_v1 = vmov 0.0   ;;  %v45_v2 = vld [vmem:[#allocation5] sm:$0xff]  ;;  %v138_v27 = vlaneseq }
  0x28   :  { %239 = vmatprep.subr.bf16.mxu0 %v378_v0  ;;  %236 = vmatprep.mubr.msk.f32.mxu0 %vm379_vm0, %v380_v1  ;;  %v46_v3 = vld [vmem:[#allocation5 + $0x8] sm:$0xff]  ;;  %v47_v4 = vld [vmem:[#allocation5 + $0x10] sm:$0xff]  ;;  %v48_v6 = vld [vmem:[#allocation5 + $0x18] sm:$0xff]  ;;  %s381_s15 = smov [#allocation8]   ;;  %s382_s17 = smov [#allocation7]  }
  0x29   :  { %v240_v5 = vpack.c.bf16 %v46_v3, %v45_v2  ;;  %v243_v7 = vpack.c.bf16 %v48_v6, %v47_v4  ;;  %v49_v8 = vld [vmem:[#allocation5 + $0x20] sm:$0xff]  ;;  %v50_v9 = vld [vmem:[#allocation5 + $0x28] sm:$0xff]  ;;  %v51_v11 = vld [vmem:[#allocation5 + $0x30] sm:$0xff]  ;;  %v139_v28 = vand.u32 127, %v138_v27  ;;  %s172_s16 = sshll.u32 %s381_s15, 4  ;;  %s173_s16 = int_to_ptr.vmem [resolvable:$true] %s172_s16 }
  0x2a   :  { %v246_v10 = vpack.c.bf16 %v50_v9, %v49_v8  ;;  %v52_v12 = vld [vmem:[#allocation5 + $0x38] sm:$0xff]  ;;  %v53_v14 = vld [vmem:[#allocation5 + $0x40] sm:$0xff]  ;;  %v54_v15 = vld [vmem:[#allocation5 + $0x48] sm:$0xff]  ;;  %s322_s18 = scalar_lea.vmem %s173_s16, 128  ;;  %p327_p3 = scmp.lt.s32.totalorder %s173_s16, %s173_s16 }
  0x2b   :  { %241 = vmatpush3.bf16.msra.mxu0 %v240_v5  ;;  %v249_v13 = vpack.c.bf16 %v52_v12, %v51_v11  ;;  %v252_v16 = vpack.c.bf16 %v54_v15, %v53_v14  ;;  %v55_v17 = vld [vmem:[#allocation5 + $0x50] sm:$0xff]  ;;  %v56_v18 = vld [vmem:[#allocation5 + $0x58] sm:$0xff]  ;;  %v57_v20 = vld [vmem:[#allocation5 + $0x60] sm:$0xff]  ;;  %vm140_vm1 = vcmp.lt.s32.totalorder %v139_v28, 16  ;;  %p323_p2 = scmp.ne.s32.totalorder %s173_s16, %s322_s18  ;;  %p328_p4 = scmp.lt.s32.totalorder %s322_s18, %s322_s18 }
  0x2c   :  { %242 = vmatprep.subr.bf16.mxu0 %v378_v0  ;;  %v255_v19 = vpack.c.bf16 %v56_v18, %v55_v17  ;;  %v58_v21 = vld [vmem:[#allocation5 + $0x68] sm:$0xff]  ;;  %v59_v23 = vld [vmem:[#allocation5 + $0x70] sm:$0xff]  ;;  %v60_v24 = vld [vmem:[#allocation5 + $0x78] sm:$0xff] }
  0x2d   :  { %v258_v22 = vpack.c.bf16 %v58_v21, %v57_v20  ;;  %v261_v25 = vpack.c.bf16 %v60_v24, %v59_v23  ;;  %v44_v26 = vld [vmem:[#allocation2] sm:$0xff]  ;;  %p329_p5 = por %p328_p4, %p327_p3 }
  0x2e   :  { %v186_v29 = vld [vmem:[%s468_s2] ss:$0 sm:$0xff]  ;;  %s162_s2 = sshll.u32 %s382_s17, 4  ;;  %s163_s2 = int_to_ptr.vmem [resolvable:$true] %s162_s2 }
  0x2f   :  { %244 = vmatpush3.bf16.msra.mxu0 %v243_v7  ;;  %p330_p6 = pnand %p329_p5, %p323_p2 }
  0x30   :  { %245 = vmatprep.subr.bf16.mxu0 %v378_v0 }
  0x33   :  { %247 = vmatpush3.bf16.msra.mxu0 %v246_v10 }
  0x34   :  { %248 = vmatprep.subr.bf16.mxu0 %v378_v0 }
  0x37   :  { %250 = vmatpush3.bf16.msra.mxu0 %v249_v13 }
  0x38   :  { %251 = vmatprep.subr.bf16.mxu0 %v378_v0 }
  0x3b   :  { %253 = vmatpush3.bf16.msra.mxu0 %v252_v16 }
  0x3c   :  { %254 = vmatprep.subr.bf16.mxu0 %v378_v0 }
  0x3f   :  { %256 = vmatpush3.bf16.msra.mxu0 %v255_v19 }
  0x40   :  { %257 = vmatprep.subr.bf16.mxu0 %v378_v0 }
  0x43   :  { %259 = vmatpush3.bf16.msra.mxu0 %v258_v22 }
  0x44   :  { %260 = vmatprep.subr.bf16.mxu0 %v378_v0 }
  0x47   :  { %262 = vmatpush3.bf16.msra.mxu0 %v261_v25 }
  0x4a   :  { %237 = vmatmul.mubr.f32.vlgmr.msra.gmra.mrb[0].mxu0 %v44_v26 }
 0x11d   :  { %v134_v30 = vpop.f32.mrb[0].mxu0 }
 0x11e   :  { %v135_v31 = vadd.f32 %v186_v29, %v134_v30  ;;  %v238_v32 = vpop.f32.mrb[1].mxu0 }
 0x120   :  { %v141_v33 = vsel %vm140_vm1, %v135_v31, -1e+30 }
 0x121   :  { %142 = vmax.xlane.f32.xlu0 %v141_v33 }
 0x1ae   :  { %v143_v34 = vpop.xlane.xlu0 %142 }
 0x1af   :  { %v144_v35 = vsub.f32 %v141_v33, %v143_v34 }
 0x1b1   :  { %v145_v36 = vmul.f32 1.442695, %v144_v35 }
 0x1b3   :  { %272 = vpow2.f32 %v145_v36 }
 0x1bd   :  { %v273_v37 = vpop.eup %272 }
 0x1be   :  { %147 = vadd.xlane.f32.xlu0 %v273_v37 }
 0x24b   :  { %v148_v38 = vpop.xlane.xlu0 %147 }
 0x24c   :  { %274 = vlog2.f32 %v148_v38 }
 0x24d   :  { %276 = vrcp.f32 %v148_v38 }
 0x256   :  { %v275_v39 = vpop.eup %274 }
 0x257   :  { %v277_v40 = vpop.eup %276  ;;  %v150_v41 = vmul.f32 0.6931472, %v275_v39 }
 0x258   :  { %v154_v42 = vmul.f32 %v277_v40, %v273_v37 }
 0x259   :  { %v151_v43 = vsub.f32 %v144_v35, %v150_v41 }
 0x25a   :  { %155 = vst [vmem:[#allocation8] sm:$0xff] %v154_v42 }
 0x25b   :  { %152 = vst [vmem:[#allocation7] sm:$0xff] %v151_v43 }
 0x25c   :  { %333 = shalt.err (!%p330_p6)
}
 0x25d   :  { %s334_s21 = scalar_lea.hbm %s470_s4, 128 }
 0x25e   :  { %p335_p7 = scmp.ne.s32.totalorder %s470_s4, %s334_s21  ;;  %p338_p8 = scmp.lt.u32.totalorder %s334_s21, %s470_s4 }
 0x260   :  { %p340_p9 = pnand %p338_p8, %p335_p7 }
 0x262   :  { %343 = shalt.err (!%p340_p9)
}
 0x263   :  { %175 = dma.vmem_to_hbm [thread:$0]  %s173_s16, 128, %s470_s4, [#allocation9]  }
 0x264   :  { %s344_s28 = scalar_lea.vmem %s163_s2, 128  ;;  %p349_p11 = scmp.lt.s32.totalorder %s163_s2, %s163_s2 }
 0x265   :  { %p345_p10 = scmp.ne.s32.totalorder %s163_s2, %s344_s28  ;;  %p350_p12 = scmp.lt.s32.totalorder %s344_s28, %s344_s28 }
 0x267   :  { %p351_p13 = por %p350_p12, %p349_p11 }
 0x269   :  { %p352_p0 = pnand %p351_p13, %p345_p10 }
 0x26b   :  { %355 = shalt.err (!%p352_p0)
}
 0x26c   :  { %s356_s5 = scalar_lea.hbm %s469_s3, 128 }
 0x26d   :  { %p357_p1 = scmp.ne.s32.totalorder %s469_s3, %s356_s5  ;;  %p360_p2 = scmp.lt.u32.totalorder %s356_s5, %s469_s3 }
 0x26f   :  { %p362_p3 = pnand %p360_p2, %p357_p1 }
 0x271   :  { %365 = shalt.err (!%p362_p3)
}
 0x272   :  { %165 = dma.vmem_to_hbm [thread:$0]  %s163_s2, 128, %s469_s3, [#allocation4]  }
 0x273   :  { %370 = dma.done.wait [#allocation4], 128  }
 0x274   :  { %371 = vsyncadd [#allocation4], 4294967168 }
 0x275   :  { %372 = dma.done.wait [#allocation9], 128  }
 0x276   :  { %373 = vsyncadd [#allocation9], 4294967168 }
 0x277   :  { %182 = vsyncpa [#allocation3], 1 }
 0x278   :  { %183 = vsyncpa [#allocation6], 1 }
 0x279   :  { %184 = vsyncpa [#allocation4], 1 }
 0x27a   :  { %185 = vsyncpa [#allocation9], 1 }

</bundles_post_ra>
